<compile_context>
chip_gen: v6e
topology: v6e:2x2x1
jax: 0.10.0
libtpu: 0.0.40
codegen_flags: <defaults>
</compile_context>

<pallas_src>
import functools

import jax
import jax.numpy as jnp
from jax.experimental import pallas as pl
from jax.experimental.pallas import tpu as pltpu

F32 = jnp.float32
BF16 = jnp.bfloat16
_VMEM_LIMIT = 48 * 1024 * 1024   # explicit scoped-VMEM budget (fits v5e/v6e/v7x)


def _round_up(x, m):
    return ((x + m - 1) // m) * m


def _full_spec(shape):
    nd = len(shape)
    return pl.BlockSpec(shape, lambda *_, nd=nd: (0,) * nd)


# ----------------------------- dense / projection kernels -------------------

def _linear_kernel(x_ref, w_ref, b_ref, o_ref):
    y = jnp.dot(x_ref[...], w_ref[...], preferred_element_type=jnp.float32)
    o_ref[...] = (y + b_ref[...]).astype(o_ref.dtype)


def _proj_l2norm_kernel(x_ref, w_ref, b_ref, o_ref):
    # Fused nn.Linear + F.normalize(dim=-1).  rsqrt(EUP) replaces sqrt+divide;
    # max(ssq, 1e-24) matches PyTorch's x / max(||x||, 1e-12).
    y = jnp.dot(x_ref[...], w_ref[...], preferred_element_type=jnp.float32) + b_ref[...]
    ssq = jnp.sum(y * y, axis=-1, keepdims=True)
    o_ref[...] = (y * jax.lax.rsqrt(jnp.maximum(ssq, 1e-24))).astype(o_ref.dtype)


def _tiled_rowwise_matmul(kernel, x, w, b, tile_m=256):
    """x: (M, K) f32, w: (K, N), b: (1, N) -> (M, N) f32.

    M padded to sublane/tile boundary and tiled over a 1-D 'parallel' grid
    (pipelined DMA, megacore-shardable).  MXU operands in bf16, f32 accumulate.
    """
    M, K = x.shape
    N = w.shape[1]
    Mp = _round_up(M, 8)
    tm = min(tile_m, Mp)
    Mp = _round_up(Mp, tm)
    xp = x if Mp == M else jnp.pad(x, ((0, Mp - M), (0, 0)))
    # TODO(synk): for very large weights, single-buffer w/b (pl.Buffered(1)).
    out = pl.pallas_call(
        kernel,
        out_shape=jax.ShapeDtypeStruct((Mp, N), F32),
        grid=(Mp // tm,),
        in_specs=[pl.BlockSpec((tm, K), lambda i: (i, 0)),
                  pl.BlockSpec((K, N), lambda i: (0, 0)),   # constant block
                  pl.BlockSpec((1, N), lambda i: (0, 0))],
        out_specs=pl.BlockSpec((tm, N), lambda i: (i, 0)),
        compiler_params=pltpu.CompilerParams(
            dimension_semantics=("parallel",),
            vmem_limit_bytes=_VMEM_LIMIT),
    )(xp.astype(BF16), w.astype(BF16), b.astype(F32))
    return out if Mp == M else out[:M]


def linear(x, w, b, tile_m=256):
    return _tiled_rowwise_matmul(_linear_kernel, x, w, b, tile_m)


def proj_and_normalize(x, w, b, tile_m=256):
    return _tiled_rowwise_matmul(_proj_l2norm_kernel, x, w, b, tile_m)


# ----------------------------- fused transformer block ----------------------

def _encoder_block_kernel(x_ref, pos_ref, mask_ref,
                          ln1g_ref, ln1b_ref, wqkv_ref, bqkv_ref, wo_ref, bo_ref,
                          ln2g_ref, ln2b_ref, w1_ref, b1_ref, w2_ref, b2_ref,
                          o_ref, *, eps):
    """Pre-LN transformer block (single head), batch folded into the M dim."""
    B, N, D = x_ref.shape
    x3 = x_ref[...].astype(jnp.float32) + pos_ref[...]        # fused pos-embed add
    neg = (mask_ref[...].astype(jnp.float32) - 1.0) * 1e9     # (B, 1, N) key mask
    x = x3.reshape(B * N, D)                                  # batch folded into M

    def ln(v, g_ref, b_ref):
        mu = jnp.mean(v, axis=-1, keepdims=True)
        var = jnp.mean((v - mu) ** 2, axis=-1, keepdims=True)
        return (v - mu) * jax.lax.rsqrt(var + eps) * g_ref[...] + b_ref[...]

    # --- self-attention (fused QKV: one (B*N, D) x (D, 3D) matmul) ---
    h = ln(x, ln1g_ref, ln1b_ref).astype(jnp.bfloat16)
    qkv = jnp.dot(h, wqkv_ref[...], preferred_element_type=jnp.float32) + bqkv_ref[...]
    q = qkv[:, :D].reshape(B, N, D).astype(jnp.bfloat16)
    k = qkv[:, D:2 * D].reshape(B, N, D).astype(jnp.bfloat16)
    v = qkv[:, 2 * D:].reshape(B, N, D).astype(jnp.bfloat16)
    scale = 1.0 / float(D) ** 0.5
    s = jnp.einsum('bqd,bkd->bqk', q, k,
                   preferred_element_type=jnp.float32) * scale       # no k.T
    s = s + neg
    s = s - jnp.max(s, axis=-1, keepdims=True)                       # NaN-safe even if fully masked
    p = jnp.exp(s)
    p = p * pl.reciprocal(jnp.sum(p, axis=-1, keepdims=True), approx=True)
    a = jnp.einsum('bqk,bkd->bqd', p.astype(jnp.bfloat16), v,
                   preferred_element_type=jnp.float32)
    a = a.reshape(B * N, D).astype(jnp.bfloat16)
    x = x + jnp.dot(a, wo_ref[...], preferred_element_type=jnp.float32) + bo_ref[...]

    # --- MLP ---
    h2 = ln(x, ln2g_ref, ln2b_ref).astype(jnp.bfloat16)
    f = jnp.dot(h2, w1_ref[...], preferred_element_type=jnp.float32) + b1_ref[...]
    # TODO(synk): HF BERT/ViT use erf-GELU; tanh approximation kept for Mosaic lowering safety.
    f = jax.nn.gelu(f, approximate=True)
    f = jnp.dot(f.astype(jnp.bfloat16), w2_ref[...],
                preferred_element_type=jnp.float32) + b2_ref[...]
    o_ref[...] = (x + f).reshape(B, N, D).astype(o_ref.dtype)


_BLOCK_PARAM_ORDER = ("ln1_g", "ln1_b", "wqkv", "bqkv", "wo", "bo",
                      "ln2_g", "ln2_b", "w1", "b1", "w2", "b2")
_BF16_PARAMS = ("wqkv", "wo", "w1", "w2")


def encoder_block(x, mask, pos, block_params, eps):
    """x: (B, N, D), mask: (B, 1, N), pos: (1, N, D) -> (B, N, D).

    Single kernel invocation: all dense matmuls operate on (B*N, D)."""
    B, N, D = x.shape
    plist = []
    for name in _BLOCK_PARAM_ORDER:
        p = block_params[name]
        plist.append(p.astype(BF16) if name in _BF16_PARAMS else p.astype(F32))
    kernel = functools.partial(_encoder_block_kernel, eps=eps)
    in_specs = [_full_spec(x.shape), _full_spec(pos.shape), _full_spec(mask.shape)]
    in_specs += [_full_spec(p.shape) for p in plist]
    return pl.pallas_call(
        kernel,
        out_shape=jax.ShapeDtypeStruct((B, N, D), F32),
        in_specs=in_specs,
        out_specs=_full_spec((B, N, D)),
        compiler_params=pltpu.CompilerParams(vmem_limit_bytes=_VMEM_LIMIT),
    )(x, pos, mask, *plist)


# ----------------------------- model pieces --------------------------------

def visual_encoder(video, vparams):
    """Stand-in for create_vit(...) encoder (patch embed + 1 transformer block)."""
    # TODO(synk): full ViT/TimeSformer depth + TESTA token-merging reduced to a
    # single transformer block; im2col gather could be folded into the
    # patch-embed BlockSpec index_map to avoid the extra HBM pass.
    B, T, C, H, W = video.shape
    p = vparams["patch_size"]
    Hp, Wp = H // p, W // p
    x = video.reshape(B, T, C, Hp, p, Wp, p)
    x = jnp.transpose(x, (0, 1, 3, 5, 2, 4, 6))              # (B,T,Hp,Wp,C,p,p)
    x = x.reshape(B * T * Hp * Wp, C * p * p).astype(F32)
    x = linear(x, vparams["w_patch"], vparams["b_patch"])    # Pallas tiled matmul
    D = x.shape[-1]
    x = x.reshape(B, T * Hp * Wp, D)
    cls = jnp.broadcast_to(vparams["cls_token"], (B, 1, D))
    x = jnp.concatenate([cls, x], axis=1)                    # (B, Nv, D)
    Nv = x.shape[1]
    Np = _round_up(Nv, 8)                                    # sublane-aligned tokens
    x = jnp.pad(x, ((0, 0), (0, Np - Nv), (0, 0)))
    pos = jnp.pad(vparams["pos_embed"], ((0, 0), (0, Np - Nv), (0, 0)))
    key_mask = (jnp.arange(Np) < Nv).astype(F32)[None, None, :]
    mask = jnp.broadcast_to(key_mask, (B, 1, Np))
    h = encoder_block(x, mask, pos, vparams["block"], eps=1e-6)   # ViT LN eps
    return h, Nv


def text_encoder(input_ids, attention_mask, tparams):
    """Stand-in for BertModel(..., mode='text')."""
    # TODO(synk): embedding gather stays in plain JAX; full BERT depth reduced
    # to a single transformer block stand-in.
    x = jnp.take(tparams["tok_embed"], input_ids, axis=0)    # (B, L, D)
    B, L, D = x.shape
    Lp = _round_up(L, 8)
    pos = tparams["pos_embed"][:, :L, :]
    am = attention_mask.astype(F32)
    if Lp != L:
        x = jnp.pad(x, ((0, 0), (0, Lp - L), (0, 0)))
        pos = jnp.pad(pos, ((0, 0), (0, Lp - L), (0, 0)))
        am = jnp.pad(am, ((0, 0), (0, Lp - L)))
    mask = am[:, None, :]                                    # (B, 1, Lp)
    h = encoder_block(x, mask, pos, tparams["block"], eps=1e-12)  # BERT LN eps
    return h[:, :L, :]


def testa_retrieval_forward(params, video, input_ids, attention_mask, alpha, idx):
    # with torch.no_grad(): self.temp.clamp_(0.001, 0.5)  — buffer update only,
    # not part of the returned forward computation.
    _temp = jnp.clip(params["temp"], 0.001, 0.5)

    video_embeds, Nv = visual_encoder(video, params["visual"])     # (B, Np, D)
    B, Np, Dv = video_embeds.shape
    vf = proj_and_normalize(video_embeds.reshape(B * Np, Dv),
                            params["vision_proj_w"],
                            params["vision_proj_b"])               # fused proj + F.normalize
    video_feat = vf.reshape(B, Np, -1)[:, :Nv, :]

    text_states = text_encoder(input_ids, attention_mask, params["text"])
    cls = text_states[:, 0, :]                                     # last_hidden_state[:, 0, :]
    text_feat = proj_and_normalize(cls,
                                   params["text_proj_w"],
                                   params["text_proj_b"])
    # TODO(synk): tokenizer / queue buffers / concat_all_gather / momentum
    # encoders are not part of the returned forward computation and are omitted.
    return video_feat, text_feat


# ----------------------------- param init ----------------------------------

def _init_block_params(key, D, Dff):
    ks = jax.random.split(key, 6)
    init = lambda k, shape: (0.02 * jax.random.normal(k, shape)).astype(F32)
    wq, wk, wv = init(ks[0], (D, D)), init(ks[1], (D, D)), init(ks[2], (D, D))
    return dict(
        ln1_g=jnp.ones((1, D), F32), ln1_b=jnp.zeros((1, D), F32),
        wqkv=jnp.concatenate([wq, wk, wv], axis=1),     # fused (D, 3D)
        bqkv=jnp.zeros((1, 3 * D), F32),
        wo=init(ks[3], (D, D)), bo=jnp.zeros((1, D), F32),
        ln2_g=jnp.ones((1, D), F32), ln2_b=jnp.zeros((1, D), F32),
        w1=init(ks[4], (D, Dff)), b1=jnp.zeros((1, Dff), F32),
        w2=init(ks[5], (Dff, D)), b2=jnp.zeros((1, D), F32),
    )


if __name__ == "__main__":
    key = jax.random.PRNGKey(0)
    B, T, C, H, W = 2, 2, 3, 16, 16      # small video: (batch, num_frames, C, H, W)
    patch = 8
    D = 128                              # vision_width == text_width (hidden)
    Dff = 256
    embed_dim = 128
    vocab = 64
    L = 8                                # max_words (small)

    keys = jax.random.split(key, 12)
    init = lambda k, shape: (0.02 * jax.random.normal(k, shape)).astype(F32)

    n_vis_tokens = 1 + T * (H // patch) * (W // patch)
    params = dict(
        temp=jnp.asarray(0.07, F32),
        visual=dict(
            patch_size=patch,
            w_patch=init(keys[0], (C * patch * patch, D)),
            b_patch=jnp.zeros((1, D), F32),
            cls_token=init(keys[1], (1, 1, D)),
            pos_embed=init(keys[2], (1, n_vis_tokens, D)),
            block=_init_block_params(keys[3], D, Dff),
        ),
        text=dict(
            tok_embed=init(keys[4], (vocab, D)),
            pos_embed=init(keys[5], (1, L, D)),
            block=_init_block_params(keys[6], D, Dff),
        ),
        vision_proj_w=init(keys[7], (D, embed_dim)),
        vision_proj_b=jnp.zeros((1, embed_dim), F32),
        text_proj_w=init(keys[8], (D, embed_dim)),
        text_proj_b=jnp.zeros((1, embed_dim), F32),
    )

    video = jax.random.normal(keys[9], (B, T, C, H, W), F32)
    input_ids = jax.random.randint(keys[10], (B, L), 0, vocab)
    attention_mask = jnp.ones((B, L), jnp.int32)
    idx = jnp.arange(B)
    alpha = 0.4

    video_feat, text_feat = testa_retrieval_forward(
        params, video, input_ids, attention_mask, alpha, idx)
    jax.block_until_ready((video_feat, text_feat))
    assert video_feat.shape == (B, n_vis_tokens, embed_dim)
    assert text_feat.shape == (B, embed_dim)
    print("KERNEL_OK")
</pallas_src>

<mosaic_0001>
module attributes {stable_mosaic.version = 11 : i64} {
  func.func @_linear_kernel(%arg0: i32, %arg1: memref<16x192xbf16, #tpu.memory_space<vmem>>, %arg2: memref<192x128xbf16, #tpu.memory_space<vmem>>, %arg3: memref<1x128xf32, #tpu.memory_space<vmem>>, %arg4: memref<16x128xf32, #tpu.memory_space<vmem>>) attributes {dimension_semantics = [#tpu.dimension_semantics<parallel>], iteration_bounds = array<i64: 1>, scalar_prefetch = 0 : i64, scratch_operands = 0 : i64, tpu.core_type = #tpu.core_type<tc>, window_params = [{transform_indices = @transform_0, window_bounds = array<i64: 16, 192>}, {pipeline_mode = #tpu.pipeline_mode<synchronous>, transform_indices = @transform_1, window_bounds = array<i64: 192, 128>}, {pipeline_mode = #tpu.pipeline_mode<synchronous>, transform_indices = @transform_2, window_bounds = array<i64: 1, 128>}, {transform_indices = @transform_3, window_bounds = array<i64: 16, 128>}]} {
    %c0 = arith.constant 0 : index
    %c0_0 = arith.constant 0 : index
    %0 = vector.load %arg1[%c0, %c0_0] : memref<16x192xbf16, #tpu.memory_space<vmem>>, vector<16x192xbf16>
    %c0_1 = arith.constant 0 : index
    %c0_2 = arith.constant 0 : index
    %1 = vector.load %arg2[%c0_1, %c0_2] : memref<192x128xbf16, #tpu.memory_space<vmem>>, vector<192x128xbf16>
    %cst = arith.constant dense<0.000000e+00> : vector<16x128xf32>
    %2 = tpu.matmul %0, %1, %cst {dimension_numbers = #tpu.dot_dimension_numbers<[1], [0], [0], [1], [0, 0, 1, 1], [], []>} : vector<16x192xbf16>, vector<192x128xbf16>, vector<16x128xf32> -> vector<16x128xf32>
    %c0_3 = arith.constant 0 : index
    %c0_4 = arith.constant 0 : index
    %3 = vector.load %arg3[%c0_3, %c0_4] : memref<1x128xf32, #tpu.memory_space<vmem>>, vector<1x128xf32>
    %4 = vector.broadcast %3 : vector<1x128xf32> to vector<16x128xf32>
    %5 = arith.addf %2, %4 : vector<16x128xf32>
    %c0_5 = arith.constant 0 : index
    %c0_6 = arith.constant 0 : index
    %6 = vector.load %arg4[%c0_5, %c0_6] : memref<16x128xf32, #tpu.memory_space<vmem>>, vector<16x128xf32>
    tpu.vector_store %arg4[%c0_5, %c0_6], %5 {strides = array<i32>} : memref<16x128xf32, #tpu.memory_space<vmem>>, vector<16x128xf32>,
    return
  }
  func.func @transform_0(%arg0: i32) -> (i32, i32) {
    %c0_i32 = arith.constant 0 : i32
    %c0_i32_0 = arith.constant 0 : i32
    return %arg0, %c0_i32 : i32, i32
  }
  func.func @transform_1(%arg0: i32) -> (i32, i32) {
    %c0_i32 = arith.constant 0 : i32
    %c0_i32_0 = arith.constant 0 : i32
    %c0_i32_1 = arith.constant 0 : i32
    return %c0_i32, %c0_i32_0 : i32, i32
  }
  func.func @transform_2(%arg0: i32) -> (i32, i32) {
    %c0_i32 = arith.constant 0 : i32
    %c0_i32_0 = arith.constant 0 : i32
    %c0_i32_1 = arith.constant 0 : i32
    return %c0_i32, %c0_i32_0 : i32, i32
  }
  func.func @transform_3(%arg0: i32) -> (i32, i32) {
    %c0_i32 = arith.constant 0 : i32
    %c0_i32_0 = arith.constant 0 : i32
    return %arg0, %c0_i32 : i32, i32
  }
}

</mosaic_0001>

<bundles_post_ra>
// kernel: tpu_custom_call.1
= control target key start
LH: loop header
LB: loop body
LE: loop exit
PB: predicated region body
PF: predicated region fallthrough
CT: control target
= control target key end

     0   :  { %8 = vsyncpa [#allocation3], 0  ;;  %s374_s0 = inlined_call_operand.hbm [shape: bf16[16,192], index: 0, kind: input, shape index: {}]   ;;  %s375_s1 = inlined_call_operand.hbm [shape: bf16[192,128], index: 1, kind: input, shape index: {}]   ;;  %s376_s2 = inlined_call_operand.vmem [shape: f32[1,128], index: 2, kind: input, shape index: {}]   ;;  %s377_s3 = inlined_call_operand.hbm [shape: f32[16,128], index: 3, kind: output, shape index: {}]  }
   0x1   :  { %9 = vsyncpa [#allocation6], 0 }
   0x2   :  { %10 = vsyncpa [#allocation4], 0  ;;  %s328_s12 = smov [#allocation2]  }
   0x3   :  { %s16_s13 = sshll.u32 %s328_s12, 4  ;;  %s17_s13 = int_to_ptr.vmem [resolvable:$true] %s16_s13 }
   0x4   :  { %s270_s14 = scalar_lea.vmem %s17_s13, 256  ;;  %p275_p1 = scmp.lt.s32.totalorder %s17_s13, %s17_s13 }
   0x5   :  { %p271_p0 = scmp.ne.s32.totalorder %s17_s13, %s270_s14  ;;  %p276_p2 = scmp.lt.s32.totalorder %s270_s14, %s270_s14 }
   0x7   :  { %p277_p3 = por %p276_p2, %p275_p1 }
   0x9   :  { %p278_p4 = pnand %p277_p3, %p271_p0 }
   0xb   :  { %281 = shalt.err (!%p278_p4)
}
   0xc   :  { %s329_s15 = smov 128   ;;  %s330_s16 = smov 8  }
   0xd   :  { %22 = dma.hbm_to_vmem [thread:$0]  %s374_s0, 256, %s17_s13, [#allocation3], %s329_s15, %s329_s15, %s330_s16  }
   0xe   :  { %s331_s19 = smov [#allocation5]  }
   0xf   :  { %s28_s20 = sshll.u32 %s331_s19, 4  ;;  %s29_s20 = int_to_ptr.vmem [resolvable:$true] %s28_s20 }
  0x10   :  { %s290_s21 = scalar_lea.vmem %s29_s20, 1536  ;;  %p295_p6 = scmp.lt.s32.totalorder %s29_s20, %s29_s20 }
  0x11   :  { %p291_p5 = scmp.ne.s32.totalorder %s29_s20, %s290_s21  ;;  %p296_p7 = scmp.lt.s32.totalorder %s290_s21, %s290_s21 }
  0x13   :  { %p297_p8 = por %p296_p7, %p295_p6 }
  0x15   :  { %p298_p9 = pnand %p297_p8, %p291_p5 }
  0x17   :  { %301 = shalt.err (!%p298_p9)
}
  0x18   :  { %s332_s22 = smov 64   ;;  %s333_s23 = smov 4  }
  0x19   :  { %34 = dma.hbm_to_vmem [thread:$0]  %s375_s1, 1536, %s29_s20, [#allocation6], %s332_s22, %s332_s22, %s333_s23  }
  0x1a   :  { %322 = dma.done.wait [#allocation3], 256  }
  0x1b   :  { %323 = vsyncadd [#allocation3], 4294967040 }
  0x1c   :  { %324 = dma.done.wait [#allocation6], 1536  }
  0x1d   :  { %325 = vsyncadd [#allocation6], 4294965760  ;;  %v334_v0 = vmov 0   ;;  %v247_v1 = vld [vmem:[#allocation5 + $0x38] sm:$0xff]   ;;  %v248_v2 = vld [vmem:[#allocation5 + $0x30] sm:$0xff]   ;;  %vm158_vm0 = vcmask 523264  }
  0x1e   :  { %162 = vmatprep.subr.bf16.mxu0 %v334_v0  ;;  %v249_v3 = vld [vmem:[#allocation5 + $0x28] sm:$0xff]   ;;  %v250_v4 = vld [vmem:[#allocation5 + $0x20] sm:$0xff]   ;;  %v261_v5 = vld [vmem:[#allocation2 + $0x4] ss:$8 sps:$4 sm:$0xff]   ;;  %s335_s26 = smov [#allocation7]  }
  0x1f   :  { %163 = vmatpush1.bf16.msra.mxu0 %v247_v1  ;;  %v251_v6 = vld [vmem:[#allocation5 + $0x18] sm:$0xff]   ;;  %238 = vmatprep.mubr.msk.bf16.mxu0 %vm158_vm0, %v261_v5  ;;  %v252_v7 = vld [vmem:[#allocation5 + $0x10] sm:$0xff]   ;;  %v253_v8 = vld [vmem:[#allocation5 + $0x8] sm:$0xff]   ;;  %s210_s27 = sshll.u32 %s335_s26, 4  ;;  %s211_s27 = int_to_ptr.vmem [resolvable:$true] %s210_s27 }
  0x20   :  { %164 = vmatprep.subr.bf16.mxu0 %v334_v0  ;;  %v254_v9 = vld [vmem:[#allocation5] sm:$0xff]   ;;  %v255_v10 = vld [vmem:[#allocation5 + $0x58] sm:$0xff]   ;;  %v256_v11 = vld [vmem:[#allocation5 + $0x50] sm:$0xff]   ;;  %s302_s28 = scalar_lea.vmem %s211_s27, 256  ;;  %p307_p11 = scmp.lt.s32.totalorder %s211_s27, %s211_s27 }
  0x21   :  { %v257_v12 = vld [vmem:[#allocation5 + $0x48] sm:$0xff]   ;;  %v258_v13 = vld [vmem:[#allocation5 + $0x40] sm:$0xff]   ;;  %v259_v14 = vld [vmem:[#allocation2] ss:$8 sps:$4 sm:$0xff]   ;;  %p303_p10 = scmp.ne.s32.totalorder %s211_s27, %s302_s28  ;;  %p308_p12 = scmp.lt.s32.totalorder %s302_s28, %s302_s28 }
  0x22   :  { %v223_v15 = vld [vmem:[%s376_s2] ss:$0 sm:$0xff] }
  0x23   :  { %165 = vmatpush1.bf16.msra.mxu0 %v248_v2  ;;  %p309_p13 = por %p308_p12, %p307_p11 }
  0x24   :  { %166 = vmatprep.subr.bf16.mxu0 %v334_v0 }
  0x25   :  { %p310_p0 = pnand %p309_p13, %p303_p10 }
  0x27   :  { %167 = vmatpush1.bf16.msra.mxu0 %v249_v3 }
  0x28   :  { %168 = vmatprep.subr.bf16.mxu0 %v334_v0 }
  0x2b   :  { %169 = vmatpush1.bf16.msra.mxu0 %v250_v4 }
  0x2c   :  { %170 = vmatprep.subr.bf16.mxu0 %v334_v0 }
  0x2f   :  { %171 = vmatpush1.bf16.msra.mxu0 %v251_v6 }
  0x30   :  { %172 = vmatprep.subr.bf16.mxu0 %v334_v0 }
  0x33   :  { %173 = vmatpush1.bf16.msra.mxu0 %v252_v7 }
  0x34   :  { %174 = vmatprep.subr.bf16.mxu0 %v334_v0 }
  0x37   :  { %175 = vmatpush1.bf16.msra.mxu0 %v253_v8 }
  0x38   :  { %176 = vmatprep.subr.bf16.mxu0 %v334_v0 }
  0x3b   :  { %177 = vmatpush1.bf16.msra.mxu0 %v254_v9 }
  0x3c   :  { %186 = vmatprep.subr.bf16.mxu0 %v334_v0 }
  0x3f   :  { %187 = vmatpush2.bf16.msra.mxu0 %v255_v10 }
  0x40   :  { %188 = vmatprep.subr.bf16.mxu0 %v334_v0 }
  0x43   :  { %189 = vmatpush2.bf16.msra.mxu0 %v256_v11 }
  0x44   :  { %190 = vmatprep.subr.bf16.mxu0 %v334_v0 }
  0x47   :  { %191 = vmatpush2.bf16.msra.mxu0 %v257_v12 }
  0x48   :  { %192 = vmatprep.subr.bf16.mxu0 %v334_v0 }
  0x4b   :  { %193 = vmatpush2.bf16.msra.mxu0 %v258_v13 }
  0x4e   :  { %195 = vmatmul.mubr.bf16.vlgmr.msra.gmra.mxu0 %v259_v14 }
 0x10e   :  { %v196_v16 = vpop.f32.mrf.mxu0 }
 0x10f   :  { %v197_v17 = vadd.f32 %v223_v15, %v196_v16 }
 0x110   :  { %v198_v18 = vpop.f32.mrf.mxu0 }
 0x111   :  { %203 = vst [vmem:[#allocation7] sm:$0xff] %v197_v17 }
 0x112   :  { %v199_v19 = vpop.f32.mrf.mxu0 }
 0x113   :  { %v200_v20 = vadd.f32 %v223_v15, %v199_v19 }
 0x114   :  { %v201_v21 = vpop.f32.mrf.mxu0 }
 0x115   :  { %204 = vst [vmem:[#allocation7 + $0x8] sm:$0xff] %v200_v20 }
 0x116   :  { %313 = shalt.err (!%p310_p0)
}
 0x117   :  { %216 = dma.vmem_to_hbm [thread:$0]  %s211_s27, 256, %s377_s3, [#allocation4], %s329_s15, %s329_s15, %s330_s16  }
 0x118   :  { %326 = dma.done.wait [#allocation4], 256  }
 0x119   :  { %327 = vsyncadd [#allocation4], 4294967040 }
 0x11a   :  { %220 = vsyncpa [#allocation3], 1 }
 0x11b   :  { %221 = vsyncpa [#allocation6], 1 }
 0x11c   :  { %222 = vsyncpa [#allocation4], 1 }

</bundles_post_ra>
